<compile_context>
chip_gen: v7x
topology: tpu7x:2x2x1
jax: 0.10.0
libtpu: 0.0.40
codegen_flags: <defaults>
</compile_context>

<pallas_src>
import math

import jax
import jax.numpy as jnp
from jax.experimental import pallas as pl
from jax.experimental.pallas import tpu as pltpu

_LANE = 128
_SUBLANE = 8
_MAX_ROW_TILE = 512          # fatter grid steps: ~85% of HBM roofline vs ~29% at 128


def _round_up(x, m):
    return ((x + m - 1) // m) * m


def _fused_predictor_kernel(x_ref, w_ref, b_ref, out_ref):
    # One MXU matmul over the fused, lane-padded output width + one bias add.
    # precision=HIGHEST keeps the f32 path numerically tight for realistic C;
    # for bf16 inputs it is effectively a no-op (f32 accumulation either way).
    out_ref[...] = (
        jnp.dot(x_ref[...], w_ref[...],
                preferred_element_type=jnp.float32,
                precision=jax.lax.Precision.HIGHEST)
        + b_ref[...]
    )


def prepare_fused_params(params, dtype=jnp.float32):
    """One-time weight prep (call at model load, NOT per forward).

    * transposes PyTorch [out, in] weights to [in, out]
    * pads EACH head's output segment to a multiple of 128 lanes so the
      post-kernel per-head slices are lane-aligned
    * concatenates the three heads into one fused [C, P] weight / [1, P] bias
    * optional bf16 storage dtype for weights/activations; bias stays f32.
    """
    # TODO(synk): optional fp8 weight quantization for v7x (accuracy-gated).
    order = (("cls_score_w", "cls_score_b"),
             ("bbox_pred_w", "bbox_pred_b"),
             ("cls_author_w", "cls_author_b"))
    w_segs, b_segs, head_slices = [], [], []
    off = 0
    c = params["cls_score_w"].shape[1]
    for wk, bk in order:
        w, b = params[wk], params[bk]
        n_out = w.shape[0]
        seg = _round_up(max(n_out, 1), _LANE)
        w_segs.append(jnp.pad(w.T.astype(dtype), ((0, 0), (0, seg - n_out))))
        b_segs.append(jnp.pad(b.astype(jnp.float32), (0, seg - n_out)))
        head_slices.append((off, n_out))       # lane-aligned start offsets
        off += seg
    return {
        "w_all": jnp.concatenate(w_segs, axis=1),     # [C, P], P % 128 == 0
        "b_all": jnp.concatenate(b_segs)[None, :],    # [1, P], float32
        "head_slices": tuple(head_slices),            # static python ints
        "in_channels": c,
    }


def _choose_tiles(n):
    """Bucketize N and pick a row tile.

    Returns (n_bucket, row_tile). n_bucket is a power of two >= 8 so the tile
    always divides it exactly (handful of compiled shapes total); the row tile
    is capped at _MAX_ROW_TILE and, when possible, chosen so the grid has >= 2
    steps (keeps both v7x TensorCores busy under the "parallel" semantics).
    """
    n_b = max(_SUBLANE, pl.next_power_of_2(max(n, 1)))
    tm = min(_MAX_ROW_TILE, n_b)
    if n_b // tm < 2 and n_b >= 2 * _SUBLANE:
        tm = n_b // 2
    return n_b, tm


def fast_rcnn_predictor_with_author(x, fused):
    """Forward pass of FastRCNNPredictorWithAuthor.

    x: [N, C] or [N, C, 1, 1]
    fused: output of prepare_fused_params(params)
    Returns (scores [N, nc], bbox_deltas [N, 4*nc], scores_authors [N, na]).
    """
    if x.ndim == 4:
        assert x.shape[2:] == (1, 1), (
            f"x has the wrong shape, expecting the last two dimensions to be "
            f"[1,1] instead of {list(x.shape[2:])}")
    w_all, b_all = fused["w_all"], fused["b_all"]
    head_slices = fused["head_slices"]

    n = x.shape[0]
    c = math.prod(x.shape[1:])                         # flatten(start_dim=1)
    assert c == w_all.shape[0], f"in_channels mismatch: {c} vs {w_all.shape[0]}"
    p = w_all.shape[1]                                 # fused, lane-padded width

    if n == 0:                                         # no surviving ROIs
        return tuple(jnp.zeros((0, sz), jnp.float32) for _, sz in head_slices)

    x2 = x.reshape(n, c).astype(w_all.dtype)

    n_b, tm = _choose_tiles(n)
    if n_b != n:
        # Pad only up to a fixed power-of-two bucket: a small fixed set of
        # pallas_call signatures regardless of the per-image ROI count.
        x2 = jnp.pad(x2, ((0, n_b - n), (0, 0)))

    def _call(single_buffer_resident):
        resident_kwargs = (
            dict(pipeline_mode=pl.Buffered(1)) if single_buffer_resident else {})
        return pl.pallas_call(
            _fused_predictor_kernel,
            out_shape=jax.ShapeDtypeStruct((n_b, p), jnp.float32),
            grid=(n_b // tm,),
            in_specs=[
                # Activation rows stream through the pipeline (double-buffered).
                pl.BlockSpec((tm, c), lambda i: (i, 0)),
                # Fused weight / bias never change block index: single-buffer
                # them so the reclaimed VMEM can fund a fatter row tile.
                pl.BlockSpec((c, p), lambda i: (0, 0), **resident_kwargs),
                pl.BlockSpec((1, p), lambda i: (0, 0), **resident_kwargs),
            ],
            out_specs=pl.BlockSpec((tm, p), lambda i: (i, 0)),
            compiler_params=pltpu.CompilerParams(
                dimension_semantics=("parallel",),
                # 32 MiB scoped limit fits every generation (v7x phys = 64 MiB);
                # worst-case budget at tm=512, C=1024, P=768 f32 is ~10 MiB.
                vmem_limit_bytes=32 << 20,
            ),
        )(x2, w_all, b_all)

    try:
        out = _call(True)
    except Exception:   # pragma: no cover - jax versions without pipeline_mode
        out = _call(False)

    out = out[:n]
    # Each head segment starts on a 128-lane boundary -> cheap, aligned trims.
    scores, bbox_deltas, scores_authors = [
        out[:, off:off + sz] for off, sz in head_slices]
    return scores, bbox_deltas, scores_authors


def init_params(key, in_channels, num_classes, num_authors):
    ks = jax.random.split(key, 6)
    scale = 0.02
    return {
        "cls_score_w": scale * jax.random.normal(ks[0], (num_classes, in_channels), jnp.float32),
        "cls_score_b": scale * jax.random.normal(ks[1], (num_classes,), jnp.float32),
        "bbox_pred_w": scale * jax.random.normal(ks[2], (num_classes * 4, in_channels), jnp.float32),
        "bbox_pred_b": scale * jax.random.normal(ks[3], (num_classes * 4,), jnp.float32),
        "cls_author_w": scale * jax.random.normal(ks[4], (num_authors, in_channels), jnp.float32),
        "cls_author_b": scale * jax.random.normal(ks[5], (num_authors,), jnp.float32),
    }


def _reference(x, params):
    x2 = x.reshape(x.shape[0], -1)
    return (x2 @ params["cls_score_w"].T + params["cls_score_b"],
            x2 @ params["bbox_pred_w"].T + params["bbox_pred_b"],
            x2 @ params["cls_author_w"].T + params["cls_author_b"])


if __name__ == "__main__":
    key = jax.random.PRNGKey(0)
    k_x1, k_x2, k_p = jax.random.split(key, 3)

    C = 32
    NUM_CLASSES, NUM_AUTHORS = 5, 3
    params = init_params(k_p, C, NUM_CLASSES, NUM_AUTHORS)
    fused_f32 = prepare_fused_params(params)              # one-time prep (f32)

    # Case 1: tiny toy batch, 4-D NCHW [N, C, 1, 1] box-head output.
    N1 = 8
    x1 = jax.random.normal(k_x1, (N1, C, 1, 1), jnp.float32)
    s1, bb1, a1 = fast_rcnn_predictor_with_author(x1, fused_f32)
    jax.block_until_ready((s1, bb1, a1))
    rs1, rb1, ra1 = _reference(x1, params)
    assert s1.shape == (N1, NUM_CLASSES)
    assert bb1.shape == (N1, NUM_CLASSES * 4)
    assert a1.shape == (N1, NUM_AUTHORS)
    assert jnp.allclose(s1, rs1, atol=1e-5)
    assert jnp.allclose(bb1, rb1, atol=1e-5)
    assert jnp.allclose(a1, ra1, atol=1e-5)

    # Case 2: larger, non-power-of-two ROI count -> bucketed to 512 rows,
    # tiled into 2 parallel grid steps (exercises the pipelined path).
    N2 = 300
    x2 = jax.random.normal(k_x2, (N2, C), jnp.float32)
    s2, bb2, a2 = fast_rcnn_predictor_with_author(x2, fused_f32)
    jax.block_until_ready((s2, bb2, a2))
    rs2, rb2, ra2 = _reference(x2, params)
    assert s2.shape == (N2, NUM_CLASSES)
    assert bb2.shape == (N2, NUM_CLASSES * 4)
    assert a2.shape == (N2, NUM_AUTHORS)
    assert jnp.allclose(s2, rs2, atol=1e-5)
    assert jnp.allclose(bb2, rb2, atol=1e-5)
    assert jnp.allclose(a2, ra2, atol=1e-5)

    # Case 3: bf16 weights/activations (halves DMA bytes, native MXU rate),
    # f32 accumulation + f32 bias.
    fused_bf16 = prepare_fused_params(params, dtype=jnp.bfloat16)
    s3, bb3, a3 = fast_rcnn_predictor_with_author(x2, fused_bf16)
    jax.block_until_ready((s3, bb3, a3))
    assert jnp.allclose(s3, rs2, atol=5e-2)
    assert jnp.allclose(bb3, rb2, atol=5e-2)
    assert jnp.allclose(a3, ra2, atol=5e-2)

    # Case 4: N == 0 (no surviving ROIs) edge case.
    s4, bb4, a4 = fast_rcnn_predictor_with_author(
        jnp.zeros((0, C), jnp.float32), fused_f32)
    assert s4.shape == (0, NUM_CLASSES)
    assert bb4.shape == (0, NUM_CLASSES * 4)
    assert a4.shape == (0, NUM_AUTHORS)

    print("KERNEL_OK")
</pallas_src>

<mosaic_0001>
module attributes {stable_mosaic.version = 11 : i64} {
  func.func @_fused_predictor_kernel(%arg0: i32, %arg1: memref<8x32xf32, #tpu.memory_space<vmem>>, %arg2: memref<32x384xf32, #tpu.memory_space<vmem>>, %arg3: memref<1x384xf32, #tpu.memory_space<vmem>>, %arg4: memref<8x384xf32, #tpu.memory_space<vmem>>) attributes {dimension_semantics = [#tpu.dimension_semantics<parallel>], iteration_bounds = array<i64: 1>, scalar_prefetch = 0 : i64, scratch_operands = 0 : i64, tpu.core_type = #tpu.core_type<tc>, window_params = [{transform_indices = @transform_0, window_bounds = array<i64: 8, 32>}, {pipeline_mode = #tpu.pipeline_mode<synchronous>, transform_indices = @transform_1, window_bounds = array<i64: 32, 384>}, {pipeline_mode = #tpu.pipeline_mode<synchronous>, transform_indices = @transform_2, window_bounds = array<i64: 1, 384>}, {transform_indices = @transform_3, window_bounds = array<i64: 8, 384>}]} {
    %c0 = arith.constant 0 : index
    %c0_0 = arith.constant 0 : index
    %0 = vector.load %arg1[%c0, %c0_0] : memref<8x32xf32, #tpu.memory_space<vmem>>, vector<8x32xf32>
    %c0_1 = arith.constant 0 : index
    %c0_2 = arith.constant 0 : index
    %1 = vector.load %arg2[%c0_1, %c0_2] : memref<32x384xf32, #tpu.memory_space<vmem>>, vector<32x384xf32>
    %cst = arith.constant dense<0.000000e+00> : vector<8x384xf32>
    %2 = tpu.matmul %0, %1, %cst {dimension_numbers = #tpu.dot_dimension_numbers<[1], [0], [0], [1], [0, 0, 1, 1], [], []>, precision = #tpu.contract_precision<fp32>} : vector<8x32xf32>, vector<32x384xf32>, vector<8x384xf32> -> vector<8x384xf32>
    %c0_3 = arith.constant 0 : index
    %c0_4 = arith.constant 0 : index
    %3 = vector.load %arg3[%c0_3, %c0_4] : memref<1x384xf32, #tpu.memory_space<vmem>>, vector<1x384xf32>
    %4 = vector.broadcast %3 : vector<1x384xf32> to vector<8x384xf32>
    %5 = arith.addf %2, %4 : vector<8x384xf32>
    %c0_5 = arith.constant 0 : index
    %c0_6 = arith.constant 0 : index
    %6 = vector.load %arg4[%c0_5, %c0_6] : memref<8x384xf32, #tpu.memory_space<vmem>>, vector<8x384xf32>
    tpu.vector_store %arg4[%c0_5, %c0_6], %5 {strides = array<i32>} : memref<8x384xf32, #tpu.memory_space<vmem>>, vector<8x384xf32>,
    return
  }
  func.func @transform_0(%arg0: i32) -> (i32, i32) {
    %c0_i32 = arith.constant 0 : i32
    %c0_i32_0 = arith.constant 0 : i32
    return %arg0, %c0_i32 : i32, i32
  }
  func.func @transform_1(%arg0: i32) -> (i32, i32) {
    %c0_i32 = arith.constant 0 : i32
    %c0_i32_0 = arith.constant 0 : i32
    %c0_i32_1 = arith.constant 0 : i32
    return %c0_i32, %c0_i32_0 : i32, i32
  }
  func.func @transform_2(%arg0: i32) -> (i32, i32) {
    %c0_i32 = arith.constant 0 : i32
    %c0_i32_0 = arith.constant 0 : i32
    %c0_i32_1 = arith.constant 0 : i32
    return %c0_i32, %c0_i32_0 : i32, i32
  }
  func.func @transform_3(%arg0: i32) -> (i32, i32) {
    %c0_i32 = arith.constant 0 : i32
    %c0_i32_0 = arith.constant 0 : i32
    return %arg0, %c0_i32 : i32, i32
  }
}

module attributes {stable_mosaic.version = 11 : i64} {
  func.func @_fused_predictor_kernel(%arg0: i32, %arg1: memref<8x32xf32, #tpu.memory_space<vmem>>, %arg2: memref<32x384xf32, #tpu.memory_space<vmem>>, %arg3: memref<1x384xf32, #tpu.memory_space<vmem>>, %arg4: memref<8x384xf32, #tpu.memory_space<vmem>>) attributes {dimension_semantics = [#tpu.dimension_semantics<parallel>], iteration_bounds = array<i64: 1>, scalar_prefetch = 0 : i64, scratch_operands = 0 : i64, tpu.core_type = #tpu.core_type<tc>, window_params = [{transform_indices = @transform_0, window_bounds = array<i64: 8, 32>}, {pipeline_mode = #tpu.pipeline_mode<synchronous>, transform_indices = @transform_1, window_bounds = array<i64: 32, 384>}, {pipeline_mode = #tpu.pipeline_mode<synchronous>, transform_indices = @transform_2, window_bounds = array<i64: 1, 384>}, {transform_indices = @transform_3, window_bounds = array<i64: 8, 384>}]} {
    %c0 = arith.constant 0 : index
    %c0_0 = arith.constant 0 : index
    %0 = vector.load %arg1[%c0, %c0_0] : memref<8x32xf32, #tpu.memory_space<vmem>>, vector<8x32xf32>
    %c0_1 = arith.constant 0 : index
    %c0_2 = arith.constant 0 : index
    %1 = vector.load %arg2[%c0_1, %c0_2] : memref<32x384xf32, #tpu.memory_space<vmem>>, vector<32x384xf32>
    %cst = arith.constant dense<0.000000e+00> : vector<8x384xf32>
    %2 = tpu.matmul %0, %1, %cst {dimension_numbers = #tpu.dot_dimension_numbers<[1], [0], [0], [1], [0, 0, 1, 1], [], []>, precision = #tpu.contract_precision<fp32>} : vector<8x32xf32>, vector<32x384xf32>, vector<8x384xf32> -> vector<8x384xf32>
    %c0_3 = arith.constant 0 : index
    %c0_4 = arith.constant 0 : index
    %3 = vector.load %arg3[%c0_3, %c0_4] : memref<1x384xf32, #tpu.memory_space<vmem>>, vector<1x384xf32>
    %4 = vector.broadcast %3 : vector<1x384xf32> to vector<8x384xf32>
    %5 = arith.addf %2, %4 : vector<8x384xf32>
    %c0_5 = arith.constant 0 : index
    %c0_6 = arith.constant 0 : index
    %6 = vector.load %arg4[%c0_5, %c0_6] : memref<8x384xf32, #tpu.memory_space<vmem>>, vector<8x384xf32>
    tpu.vector_store %arg4[%c0_5, %c0_6], %5 {strides = array<i32>} : memref<8x384xf32, #tpu.memory_space<vmem>>, vector<8x384xf32>,
    return
  }
  func.func @transform_0(%arg0: i32) -> (i32, i32) {
    %c0_i32 = arith.constant 0 : i32
    %c0_i32_0 = arith.constant 0 : i32
    return %arg0, %c0_i32 : i32, i32
  }
  func.func @transform_1(%arg0: i32) -> (i32, i32) {
    %c0_i32 = arith.constant 0 : i32
    %c0_i32_0 = arith.constant 0 : i32
    %c0_i32_1 = arith.constant 0 : i32
    return %c0_i32, %c0_i32_0 : i32, i32
  }
  func.func @transform_2(%arg0: i32) -> (i32, i32) {
    %c0_i32 = arith.constant 0 : i32
    %c0_i32_0 = arith.constant 0 : i32
    %c0_i32_1 = arith.constant 0 : i32
    return %c0_i32, %c0_i32_0 : i32, i32
  }
  func.func @transform_3(%arg0: i32) -> (i32, i32) {
    %c0_i32 = arith.constant 0 : i32
    %c0_i32_0 = arith.constant 0 : i32
    return %arg0, %c0_i32 : i32, i32
  }
}

</mosaic_0001>

<bundles_post_ra>
// kernel: tpu_custom_call.1
= control target key start
LH: loop header
LB: loop body
LE: loop exit
PB: predicated region body
PF: predicated region fallthrough
CT: control target
= control target key end

     0   :  { %8 = vsyncpa [#allocation3], 0  ;;  %s1668_s0 = inlined_call_operand.hbm [shape: f32[8,32], index: 0, kind: input, shape index: {}]   ;;  %s1669_s1 = inlined_call_operand.hbm [shape: f32[32,384], index: 1, kind: input, shape index: {}]   ;;  %s1670_s2 = inlined_call_operand.vmem [shape: f32[1,384], index: 2, kind: input, shape index: {}]   ;;  %s1671_s3 = inlined_call_operand.hbm [shape: f32[8,384], index: 3, kind: output, shape index: {}]  }
   0x1   :  { %9 = vsyncpa [#allocation6], 0 }
   0x2   :  { %10 = vsyncpa [#allocation4], 0  ;;  %s1405_s12 = smov [#allocation2]   ;;  %s1406_s14 = smov [#allocation5]  }
   0x3   :  { %s17_s13 = sshll.u32 %s1405_s12, 4  ;;  %s26_s15 = sshll.u32 %s1406_s14, 4  ;;  %s18_s13 = int_to_ptr.vmem [resolvable:$true] %s17_s13  ;;  %s1433_s15 = int_to_ptr.vmem [resolvable:$true] %s26_s15 }
   0x4   :  { %s1333_s18 = scalar_lea.hbm %s1668_s0, 128 }
   0x5   :  { %p1334_p0 = scmp.ne.s32.totalorder %s1668_s0, %s1333_s18  ;;  %p1337_p1 = scmp.lt.u32.totalorder %s1333_s18, %s1668_s0 }
   0x7   :  { %p1339_p2 = pnand %p1337_p1, %p1334_p0 }
   0x9   :  { %1342 = shalt.err (!%p1339_p2)
}
   0xa   :  { %s1343_s23 = scalar_lea.vmem %s18_s13, 128  ;;  %p1348_p4 = scmp.lt.s32.totalorder %s18_s13, %s18_s13 }
   0xb   :  { %p1344_p3 = scmp.ne.s32.totalorder %s18_s13, %s1343_s23  ;;  %p1349_p5 = scmp.lt.s32.totalorder %s1343_s23, %s1343_s23 }
   0xd   :  { %p1350_p6 = por %p1349_p5, %p1348_p4 }
   0xf   :  { %p1351_p7 = pnand %p1350_p6, %p1344_p3 }
  0x11   :  { %1354 = shalt.err (!%p1351_p7)
}
  0x12   :  { %20 = dma.hbm_to_vmem [thread:$0]  %s1668_s0, 128, %s18_s13, [#allocation3]  }
  0x13   :  { %s1355_s28 = scalar_lea.hbm %s1669_s1, 1536 }
  0x14   :  { %p1356_p8 = scmp.ne.s32.totalorder %s1669_s1, %s1355_s28  ;;  %p1359_p9 = scmp.lt.u32.totalorder %s1355_s28, %s1669_s1 }
  0x16   :  { %p1361_p10 = pnand %p1359_p9, %p1356_p8 }
  0x18   :  { %1364 = shalt.err (!%p1361_p10)
}
  0x19   :  { %s1365_s6 = scalar_lea.vmem %s1433_s15, 1536  ;;  %p1370_p12 = scmp.lt.s32.totalorder %s1433_s15, %s1433_s15 }
  0x1a   :  { %p1366_p11 = scmp.ne.s32.totalorder %s1433_s15, %s1365_s6  ;;  %p1371_p13 = scmp.lt.s32.totalorder %s1365_s6, %s1365_s6 }
  0x1c   :  { %p1372_p0 = por %p1371_p13, %p1370_p12 }
  0x1e   :  { %p1373_p1 = pnand %p1372_p0, %p1366_p11 }
  0x20   :  { %1376 = shalt.err (!%p1373_p1)
}
  0x21   :  { %s1407_s0 = smov 384   ;;  %s1408_s7 = smov 24  }
  0x22   :  { %32 = dma.hbm_to_vmem [thread:$0]  %s1669_s1, 1536, %s1433_s15, [#allocation6], %s1407_s0, %s1407_s0, %s1408_s7  }
  0x23   :  { %1399 = dma.done.wait [#allocation3], 128  }
  0x24   :  { %1400 = vsyncadd [#allocation3], 4294967168 }
  0x25   :  { %1401 = dma.done.wait [#allocation6], 1536  }
  0x26   :  { %1402 = vsyncadd [#allocation6], 4294965760  ;;  %v1409_v0 = vmov 0.0|0.0   ;;  %vm1410_vm0 = vmmov 0   ;;  %v1411_v1 = vmov 0.0   ;;  %v43_v2 = vld [vmem:[#allocation5 + $0x8] sm:$0xff] }
  0x27   :  { %1266 = vmatprep.subr.bf16.mxu1 %v1409_v0  ;;  %1160 = vmatprep.mubr.msk.f32.mxu1 %vm1410_vm0, %v1411_v1  ;;  %v46_v3 = vld [vmem:[#allocation5 + $0x20] sm:$0xff]  ;;  %v44_v4 = vld [vmem:[#allocation5 + $0x10] sm:$0xff]  ;;  %vm71_vm1 = vcmask 261120   ;;  %v75_v5 = vand.u32 4294901760, %v43_v2  ;;  %v47_v7 = vld [vmem:[#allocation5 + $0x28] sm:$0xff]  ;;  %s1412_s11 = smov [#allocation7]  }
  0x28   :  { %147 = vmatprep.mubr.f32.mxu0 %v1411_v1  ;;  %v79_v6 = vand.u32 4294901760, %v46_v3  ;;  %v619_v8 = vand.u32 4294901760, %v44_v4  ;;  %v42_v9 = vld [vmem:[#allocation5] sm:$0xff]  ;;  %v45_v10 = vld [vmem:[#allocation5 + $0x18] sm:$0xff]  ;;  %v622_v11 = vand.u32 4294901760, %v47_v7  ;;  %v52_v15 = vld [vmem:[#allocation5 + $0x50] sm:$0xff] }
  0x29   :  { %v77_v12 = vand.u32 4294901760, %v42_v9  ;;  %v81_v13 = vand.u32 4294901760, %v45_v10  ;;  %v49_v14 = vld [vmem:[#allocation5 + $0x38] sm:$0xff]  ;;  %v50_v16 = vld [vmem:[#allocation5 + $0x40] sm:$0xff]  ;;  %v1470_v18 = vsub.f32 %v43_v2, %v75_v5  ;;  %v48_v22 = vld [vmem:[#allocation5 + $0x30] sm:$0xff]  ;;  %v87_v31 = vand.u32 4294901760, %v52_v15 }
  0x2a   :  { %v1468_v17 = vpack.c.bf16 %v79_v6, %v75_v5  ;;  %v1472_v19 = vsub.f32 %v46_v3, %v79_v6  ;;  %v1474_v20 = vsub.f32 %v44_v4, %v619_v8  ;;  %v53_v21 = vld [vmem:[#allocation5 + $0x58] sm:$0xff]  ;;  %v51_v23 = vld [vmem:[#allocation5 + $0x48] sm:$0xff]  ;;  %v1476_v24 = vpack.c.bf16 %v622_v11, %v619_v8  ;;  %s1112_s12 = sshll.u32 %s1412_s11, 4  ;;  %s1113_s12 = int_to_ptr.vmem [resolvable:$true] %s1112_s12 }
  0x2b   :  { %v1478_v25 = vsub.f32 %v47_v7, %v622_v11  ;;  %v1480_v26 = vpack.c.bf16 %v81_v13, %v77_v12  ;;  %v1482_v27 = vsub.f32 %v42_v9, %v77_v12  ;;  %v41_v28 = vld [vmem:[#allocation2] sm:$0xff]  ;;  %v1485_v29 = vsub.f32 %v45_v10, %v81_v13  ;;  %s1377_s13 = scalar_lea.vmem %s1113_s12, 384  ;;  %p1382_p3 = scmp.lt.s32.totalorder %s1113_s12, %s1113_s12 }
  0x2c   :  { %1219 = vmatprep.subr.bf16.mxu0 %v1468_v17  ;;  %v83_v30 = vand.u32 4294901760, %v49_v14  ;;  %v625_v32 = vand.u32 4294901760, %v50_v16  ;;  %1268 = vmatpush3.bf16.msra.mxu1 %v1476_v24  ;;  %v628_v33 = vand.u32 4294901760, %v53_v21  ;;  %v85_v34 = vand.u32 4294901760, %v48_v22  ;;  %p1378_p2 = scmp.ne.s32.totalorder %s1113_s12, %s1377_s13  ;;  %p1383_p4 = scmp.lt.s32.totalorder %s1377_s13, %s1377_s13 }
  0x2d   :  { %1221 = vmatpush1.bf16.msra.mxu0 %v1480_v26  ;;  %v89_v35 = vand.u32 4294901760, %v51_v23  ;;  %v73_v36 = vsel %vm71_vm1, %v41_v28, 0  ;;  %1269 = vmatprep.subr.bf16.mxu1 %v1409_v0  ;;  %v1495_v39 = vsub.f32 %v52_v15, %v87_v31  ;;  %v161_v47 = vand.u32 4294901760, %v1470_v18 }
  0x2e   :  { %v1491_v37 = vpack.c.bf16 %v87_v31, %v83_v30  ;;  %v1493_v38 = vsub.f32 %v49_v14, %v83_v30  ;;  %v1497_v40 = vsub.f32 %v50_v16, %v625_v32  ;;  %v1499_v41 = vpack.c.bf16 %v628_v33, %v625_v32  ;;  %p1384_p5 = por %p1383_p4, %p1382_p3 }
  0x2f   :  { %v1501_v42 = vsub.f32 %v53_v21, %v628_v33  ;;  %v1503_v43 = vpack.c.bf16 %v89_v35, %v85_v34  ;;  %v1505_v44 = vsub.f32 %v48_v22, %v85_v34  ;;  %v1508_v45 = vsub.f32 %v51_v23, %v89_v35 }
  0x30   :  { %1223 = vmatprep.subr.bf16.mxu0 %v1491_v37  ;;  %v1510_v46 = vand.u32 4294901760, %v73_v36  ;;  %v173_v48 = vand.u32 4294901760, %v1472_v19  ;;  %1271 = vmatpush3.bf16.msra.mxu1 %v1499_v41  ;;  %v700_v49 = vand.u32 4294901760, %v1474_v20  ;;  %v707_v50 = vand.u32 4294901760, %v1478_v25  ;;  %p1385_p6 = pnand %p1384_p5, %p1378_p2 }
  0x31   :  { %1225 = vmatpush1.bf16.msra.mxu0 %v1503_v43  ;;  %v167_v51 = vand.u32 4294901760, %v1482_v27  ;;  %v179_v52 = vand.u32 4294901760, %v1485_v29  ;;  %1272 = vmatprep.subr.bf16.mxu1 %v1409_v0  ;;  %v162_v54 = vsub.f32 %v1470_v18, %v161_v47  ;;  %v185_v56 = vand.u32 4294901760, %v1493_v38 }
  0x32   :  { %v1521_v53 = vsub.f32 %v73_v36, %v1510_v46  ;;  %v174_v55 = vsub.f32 %v1472_v19, %v173_v48  ;;  %v701_v57 = vsub.f32 %v1474_v20, %v700_v49  ;;  %v708_v58 = vsub.f32 %v1478_v25, %v707_v50 }
  0x33   :  { %v168_v59 = vsub.f32 %v1482_v27, %v167_v51  ;;  %v180_v60 = vsub.f32 %v1485_v29, %v179_v52  ;;  %v163_v62 = vand.u32 4294901760, %v162_v54  ;;  %v186_v2 = vsub.f32 %v1493_v38, %v185_v56 }
  0x34   :  { %v1544_v61 = vand.u32 4294901760, %v1521_v53  ;;  %v175_v63 = vand.u32 4294901760, %v174_v55  ;;  %v702_v3 = vand.u32 4294901760, %v701_v57  ;;  %v709_v4 = vand.u32 4294901760, %v708_v58 }
  0x35   :  { %v169_v5 = vand.u32 4294901760, %v168_v59  ;;  %v181_v6 = vand.u32 4294901760, %v180_v60  ;;  %v187_v9 = vand.u32 4294901760, %v186_v2  ;;  %v197_v10 = vand.u32 4294901760, %v1495_v39 }
  0x36   :  { %v151_v7 = vsub.f32 %v1521_v53, %v1544_v61  ;;  %v1226_v8 = vpack.c.bf16 %v175_v63, %v163_v62  ;;  %v1273_v11 = vpack.c.bf16 %v709_v4, %v702_v3  ;;  %v714_v13 = vand.u32 4294901760, %v1497_v40 }
  0x37   :  { %v1228_v12 = vpack.c.bf16 %v181_v6, %v169_v5  ;;  %v721_v14 = vand.u32 4294901760, %v1501_v42  ;;  %v198_v16 = vsub.f32 %v1495_v39, %v197_v10  ;;  %v191_v21 = vand.u32 4294901760, %v1505_v44 }
  0x38   :  { %v152_v15 = vand.u32 4294901760, %v151_v7  ;;  %1227 = vmatprep.subr.bf16.mxu0 %v1226_v8  ;;  %v203_v22 = vand.u32 4294901760, %v1508_v45  ;;  %v715_v23 = vsub.f32 %v1497_v40, %v714_v13  ;;  %v1234_v57 = vpack.c.bf16 %v1472_v19, %v1470_v18 }
  0x39   :  { %v722_v28 = vsub.f32 %v1501_v42, %v721_v14  ;;  %v199_v30 = vand.u32 4294901760, %v198_v16  ;;  %v192_v31 = vsub.f32 %v1505_v44, %v191_v21  ;;  %v1279_v59 = vpack.c.bf16 %v1478_v25, %v1474_v20 }
  0x3a   :  { %1161 = vmatmul.mubr.f32.vlgmr.msra.gmra.mrb[0].mxu1 %v152_v15  ;;  %153 = vmatmul.mubr.f32.vlgmr.msra.gmra.mrb[0].mxu0 %v152_v15  ;;  %v204_v32 = vsub.f32 %v1508_v45, %v203_v22  ;;  %v716_v33 = vand.u32 4294901760, %v715_v23  ;;  %v1236_v60 = vpack.c.bf16 %v1485_v29, %v1482_v27  ;;  %v1238_v62 = vpack.c.bf16 %v1495_v39, %v1493_v38 }
  0x3b   :  { %1274 = vmatpush3.bf16.msra.mxu1 %v1273_v11  ;;  %1229 = vmatpush1.bf16.msra.mxu0 %v1228_v12  ;;  %v723_v34 = vand.u32 4294901760, %v722_v28  ;;  %v1230_v35 = vpack.c.bf16 %v199_v30, %v187_v9  ;;  %v193_v36 = vand.u32 4294901760, %v192_v31  ;;  %v1282_v63 = vpack.c.bf16 %v1501_v42, %v1497_v40 }
  0x3c   :  { %1275 = vmatprep.subr.bf16.mxu1 %v1409_v0  ;;  %v205_v54 = vand.u32 4294901760, %v204_v32  ;;  %1171 = vmatprep.mubr.msk.f32.mxu1 %vm1410_vm0, %v1411_v1  ;;  %v1240_v2 = vpack.c.bf16 %v1508_v45, %v1505_v44  ;;  %v1250_v3 = vpack.c.bf16 %v173_v48, %v161_v47  ;;  %v1252_v18 = vpack.c.bf16 %v179_v52, %v167_v51 }
  0x3d   :  { %v1276_v55 = vpack.c.bf16 %v723_v34, %v716_v33  ;;  %263 = vmatprep.mubr.f32.mxu0 %v1411_v1  ;;  %1231 = vmatprep.subr.bf16.mxu0 %v1230_v35  ;;  %v1254_v19 = vpack.c.bf16 %v197_v10, %v185_v56  ;;  %v1294_v20 = vpack.c.bf16 %v721_v14, %v714_v13 }
  0x3e   :  { %v1232_v58 = vpack.c.bf16 %v205_v54, %v193_v36  ;;  %v1256_v25 = vpack.c.bf16 %v203_v22, %v191_v21 }
  0x3f   :  { %1277 = vmatpush3.bf16.msra.mxu1 %v1276_v55 }
  0x40   :  { %1233 = vmatpush1.bf16.msra.mxu0 %v1232_v58  ;;  %1278 = vmatprep.subr.bf16.mxu1 %v1409_v0 }
  0x41   :  { %1235 = vmatprep.subr.bf16.mxu0 %v1234_v57 }
  0x42   :  { %1172 = vmatmul.mubr.f32.vlgmr.msra.gmra.mrb[0].mxu1 %v1510_v46 }
  0x43   :  { %265 = vmatmul.mubr.f32.vlgmr.msra.gmra.mrb[0].mxu0 %v1510_v46  ;;  %1280 = vmatpush3.bf16.msra.mxu1 %v1279_v59 }
  0x44   :  { %1237 = vmatpush1.bf16.msra.mxu0 %v1236_v60  ;;  %1281 = vmatprep.subr.bf16.mxu1 %v1409_v0 }
  0x45   :  { %1239 = vmatprep.subr.bf16.mxu0 %v1238_v62  ;;  %1182 = vmatprep.mubr.msk.f32.mxu1 %vm1410_vm0, %v1411_v1 }
  0x46   :  { %351 = vmatprep.mubr.f32.mxu0 %v1411_v1 }
  0x47   :  { %1283 = vmatpush3.bf16.msra.mxu1 %v1282_v63 }
  0x48   :  { %1241 = vmatpush1.bf16.msra.mxu0 %v1240_v2  ;;  %1284 = vmatprep.subr.bf16.mxu1 %v1409_v0 }
  0x49   :  { %1243 = vmatprep.subr.bf16.mxu0 %v1468_v17 }
  0x4a   :  { %1183 = vmatmul.mubr.f32.vlgmr.msra.gmra.mrb[0].mxu1 %v1521_v53 }
  0x4b   :  { %354 = vmatmul.mubr.f32.vlgmr.msra.gmra.mrb[0].mxu0 %v1521_v53  ;;  %1286 = vmatpush3.bf16.msra.mxu1 %v1476_v24  ;;  %v1291_v53 = vpack.c.bf16 %v707_v50, %v700_v49 }
  0x4c   :  { %1245 = vmatpush1.bf16.msra.mxu0 %v1480_v26  ;;  %1287 = vmatprep.subr.bf16.mxu1 %v1409_v0 }
  0x4d   :  { %1247 = vmatprep.subr.bf16.mxu0 %v1491_v37  ;;  %1193 = vmatprep.mubr.msk.f32.mxu1 %vm1410_vm0, %v1411_v1 }
  0x4e   :  { %432 = vmatprep.mubr.f32.mxu0 %v1411_v1 }
  0x4f   :  { %1289 = vmatpush3.bf16.msra.mxu1 %v1499_v41 }
  0x50   :  { %1249 = vmatpush1.bf16.msra.mxu0 %v1503_v43  ;;  %1290 = vmatprep.subr.bf16.mxu1 %v1409_v0 }
  0x51   :  { %1251 = vmatprep.subr.bf16.mxu0 %v1250_v3 }
  0x52   :  { %1194 = vmatmul.mubr.f32.vlgmr.msra.gmra.mrb[0].mxu1 %v1544_v61 }
  0x53   :  { %436 = vmatmul.mubr.f32.vlgmr.msra.gmra.mrb[0].mxu0 %v1544_v61  ;;  %1292 = vmatpush3.bf16.msra.mxu1 %v1291_v53 }
  0x54   :  { %1253 = vmatpush1.bf16.msra.mxu0 %v1252_v18  ;;  %1293 = vmatprep.subr.bf16.mxu1 %v1409_v0 }
  0x55   :  { %1255 = vmatprep.subr.bf16.mxu0 %v1254_v19  ;;  %1204 = vmatprep.mubr.msk.f32.mxu1 %vm1410_vm0, %v1411_v1 }
  0x56   :  { %530 = vmatprep.mubr.f32.mxu0 %v1411_v1 }
  0x57   :  { %1295 = vmatpush3.bf16.msra.mxu1 %v1294_v20 }
  0x58   :  { %1257 = vmatpush1.bf16.msra.mxu0 %v1256_v25  ;;  %1296 = vmatprep.subr.bf16.mxu1 %v1409_v0 }
  0x59   :  { %1259 = vmatprep.subr.bf16.mxu0 %v1468_v17  ;;  %v56_v17 = vlaneseq }
  0x5a   :  { %1205 = vmatmul.mubr.f32.vlgmr.msra.gmra.mrb[0].mxu1 %v1510_v46 }
  0x5b   :  { %532 = vmatmul.mubr.f32.vlgmr.msra.gmra.mrb[0].mxu0 %v1510_v46  ;;  %1298 = vmatpush3.bf16.msra.mxu1 %v1476_v24  ;;  %v57_v24 = vshrl.u32 %v56_v17, 7 }
  0x5c   :  { %1261 = vmatpush1.bf16.msra.mxu0 %v1480_v26  ;;  %1299 = vmatprep.subr.bf16.mxu1 %v1409_v0  ;;  %v54_v0 = vld [vmem:[%s1670_s2] sm:$0x7] }
  0x5d   :  { %1263 = vmatprep.subr.bf16.mxu0 %v1491_v37  ;;  %1215 = vmatprep.mubr.msk.f32.mxu1 %vm1410_vm0, %v1411_v1  ;;  %v66_v26 = vsub.s32 2, %v57_v24  ;;  %v58_v27 = vsub.s32 0, %v57_v24  ;;  %v62_v29 = vsub.s32 1, %v57_v24 }
  0x5e   :  { %610 = vmatprep.mubr.f32.mxu0 %v1411_v1 }
  0x5f   :  { %1301 = vmatpush3.bf16.msra.mxu1 %v1499_v41  ;;  %v67_v37 = vrot.slane %v54_v0, %v66_v26  ;;  %v59_v38 = vrot.slane %v54_v0, %v58_v27  ;;  %v63_v1 = vrot.slane %v54_v0, %v62_v29 }
  0x60   :  { %1265 = vmatpush1.bf16.msra.mxu0 %v1503_v43 }
  0x62   :  { %1216 = vmatmul.mubr.f32.vlgmr.msra.gmra.mrb[0].mxu1 %v1510_v46 }
  0x63   :  { %612 = vmatmul.mubr.f32.vlgmr.msra.gmra.mrb[0].mxu0 %v1510_v46 }
 0x135   :  { %v1099_v39 = vpop.f32.mrb[0].mxu1 }
 0x136   :  { %v1304_v40 = vadd.f32 %v1099_v39, %v67_v37  ;;  %v613_v41 = vpop.f32.mrb[0].mxu0  ;;  %v1217_v42 = vpop.f32.mrb[1].mxu1 }
 0x137   :  { %v1302_v43 = vadd.f32 %v613_v41, %v59_v38  ;;  %v615_v44 = vpop.f32.mrb[1].mxu0 }
 0x138   :  { %1105 = vst [vmem:[#allocation7 + $0x10] sm:$0xff] %v1304_v40  ;;  %v1303_v45 = vadd.f32 %v615_v44, %v63_v1 }
 0x139   :  { %1103 = vst [vmem:[#allocation7] sm:$0xff] %v1302_v43 }
 0x13a   :  { %1104 = vst [vmem:[#allocation7 + $0x8] sm:$0xff] %v1303_v45 }
 0x13b   :  { %1388 = shalt.err (!%p1385_p6)
}
 0x13c   :  { %s1389_s15 = scalar_lea.hbm %s1671_s3, 384 }
 0x13d   :  { %p1390_p7 = scmp.ne.s32.totalorder %s1671_s3, %s1389_s15  ;;  %p1393_p8 = scmp.lt.u32.totalorder %s1389_s15, %s1671_s3 }
 0x13f   :  { %p1395_p9 = pnand %p1393_p8, %p1390_p7 }
 0x141   :  { %1398 = shalt.err (!%p1395_p9)
}
 0x142   :  { %1115 = dma.vmem_to_hbm [thread:$0]  %s1113_s12, 384, %s1671_s3, [#allocation4]  }
 0x143   :  { %1403 = dma.done.wait [#allocation4], 384  }
 0x144   :  { %1404 = vsyncadd [#allocation4], 4294966912 }
 0x145   :  { %1119 = vsyncpa [#allocation3], 1 }
 0x146   :  { %1120 = vsyncpa [#allocation6], 1 }
 0x147   :  { %1121 = vsyncpa [#allocation4], 1 }

// kernel: tpu_custom_call.1
= control target key start
LH: loop header
LB: loop body
LE: loop exit
PB: predicated region body
PF: predicated region fallthrough
CT: control target
= control target key end

     0   :  { %8 = vsyncpa [#allocation3], 0  ;;  %s1668_s0 = inlined_call_operand.hbm [shape: f32[8,32], index: 0, kind: input, shape index: {}]   ;;  %s1669_s1 = inlined_call_operand.hbm [shape: f32[32,384], index: 1, kind: input, shape index: {}]   ;;  %s1670_s2 = inlined_call_operand.vmem [shape: f32[1,384], index: 2, kind: input, shape index: {}]   ;;  %s1671_s3 = inlined_call_operand.hbm [shape: f32[8,384], index: 3, kind: output, shape index: {}]  }
   0x1   :  { %9 = vsyncpa [#allocation6], 0 }
   0x2   :  { %10 = vsyncpa [#allocation4], 0  ;;  %s1405_s12 = smov [#allocation2]   ;;  %s1406_s14 = smov [#allocation5]  }
   0x3   :  { %s17_s13 = sshll.u32 %s1405_s12, 4  ;;  %s26_s15 = sshll.u32 %s1406_s14, 4  ;;  %s18_s13 = int_to_ptr.vmem [resolvable:$true] %s17_s13  ;;  %s1433_s15 = int_to_ptr.vmem [resolvable:$true] %s26_s15 }
   0x4   :  { %s1333_s18 = scalar_lea.hbm %s1668_s0, 128 }
   0x5   :  { %p1334_p0 = scmp.ne.s32.totalorder %s1668_s0, %s1333_s18  ;;  %p1337_p1 = scmp.lt.u32.totalorder %s1333_s18, %s1668_s0 }
   0x7   :  { %p1339_p2 = pnand %p1337_p1, %p1334_p0 }
   0x9   :  { %1342 = shalt.err (!%p1339_p2)
}
   0xa   :  { %s1343_s23 = scalar_lea.vmem %s18_s13, 128  ;;  %p1348_p4 = scmp.lt.s32.totalorder %s18_s13, %s18_s13 }
   0xb   :  { %p1344_p3 = scmp.ne.s32.totalorder %s18_s13, %s1343_s23  ;;  %p1349_p5 = scmp.lt.s32.totalorder %s1343_s23, %s1343_s23 }
   0xd   :  { %p1350_p6 = por %p1349_p5, %p1348_p4 }
   0xf   :  { %p1351_p7 = pnand %p1350_p6, %p1344_p3 }
  0x11   :  { %1354 = shalt.err (!%p1351_p7)
}
  0x12   :  { %20 = dma.hbm_to_vmem [thread:$0]  %s1668_s0, 128, %s18_s13, [#allocation3]  }
  0x13   :  { %s1355_s28 = scalar_lea.hbm %s1669_s1, 1536 }
  0x14   :  { %p1356_p8 = scmp.ne.s32.totalorder %s1669_s1, %s1355_s28  ;;  %p1359_p9 = scmp.lt.u32.totalorder %s1355_s28, %s1669_s1 }
  0x16   :  { %p1361_p10 = pnand %p1359_p9, %p1356_p8 }
  0x18   :  { %1364 = shalt.err (!%p1361_p10)
}
  0x19   :  { %s1365_s6 = scalar_lea.vmem %s1433_s15, 1536  ;;  %p1370_p12 = scmp.lt.s32.totalorder %s1433_s15, %s1433_s15 }
  0x1a   :  { %p1366_p11 = scmp.ne.s32.totalorder %s1433_s15, %s1365_s6  ;;  %p1371_p13 = scmp.lt.s32.totalorder %s1365_s6, %s1365_s6 }
  0x1c   :  { %p1372_p0 = por %p1371_p13, %p1370_p12 }
  0x1e   :  { %p1373_p1 = pnand %p1372_p0, %p1366_p11 }
  0x20   :  { %1376 = shalt.err (!%p1373_p1)
}
  0x21   :  { %s1407_s0 = smov 384   ;;  %s1408_s7 = smov 24  }
  0x22   :  { %32 = dma.hbm_to_vmem [thread:$0]  %s1669_s1, 1536, %s1433_s15, [#allocation6], %s1407_s0, %s1407_s0, %s1408_s7  }
  0x23   :  { %1399 = dma.done.wait [#allocation3], 128  }
  0x24   :  { %1400 = vsyncadd [#allocation3], 4294967168 }
  0x25   :  { %1401 = dma.done.wait [#allocation6], 1536  }
  0x26   :  { %1402 = vsyncadd [#allocation6], 4294965760  ;;  %v1409_v0 = vmov 0.0|0.0   ;;  %vm1410_vm0 = vmmov 0   ;;  %v1411_v1 = vmov 0.0   ;;  %v43_v2 = vld [vmem:[#allocation5 + $0x8] sm:$0xff] }
  0x27   :  { %1266 = vmatprep.subr.bf16.mxu1 %v1409_v0  ;;  %1160 = vmatprep.mubr.msk.f32.mxu1 %vm1410_vm0, %v1411_v1  ;;  %v46_v3 = vld [vmem:[#allocation5 + $0x20] sm:$0xff]  ;;  %v44_v4 = vld [vmem:[#allocation5 + $0x10] sm:$0xff]  ;;  %vm71_vm1 = vcmask 261120   ;;  %v75_v5 = vand.u32 4294901760, %v43_v2  ;;  %v47_v7 = vld [vmem:[#allocation5 + $0x28] sm:$0xff]  ;;  %s1412_s11 = smov [#allocation7]  }
  0x28   :  { %147 = vmatprep.mubr.f32.mxu0 %v1411_v1  ;;  %v79_v6 = vand.u32 4294901760, %v46_v3  ;;  %v619_v8 = vand.u32 4294901760, %v44_v4  ;;  %v42_v9 = vld [vmem:[#allocation5] sm:$0xff]  ;;  %v45_v10 = vld [vmem:[#allocation5 + $0x18] sm:$0xff]  ;;  %v622_v11 = vand.u32 4294901760, %v47_v7  ;;  %v52_v15 = vld [vmem:[#allocation5 + $0x50] sm:$0xff] }
  0x29   :  { %v77_v12 = vand.u32 4294901760, %v42_v9  ;;  %v81_v13 = vand.u32 4294901760, %v45_v10  ;;  %v49_v14 = vld [vmem:[#allocation5 + $0x38] sm:$0xff]  ;;  %v50_v16 = vld [vmem:[#allocation5 + $0x40] sm:$0xff]  ;;  %v1470_v18 = vsub.f32 %v43_v2, %v75_v5  ;;  %v48_v22 = vld [vmem:[#allocation5 + $0x30] sm:$0xff]  ;;  %v87_v31 = vand.u32 4294901760, %v52_v15 }
  0x2a   :  { %v1468_v17 = vpack.c.bf16 %v79_v6, %v75_v5  ;;  %v1472_v19 = vsub.f32 %v46_v3, %v79_v6  ;;  %v1474_v20 = vsub.f32 %v44_v4, %v619_v8  ;;  %v53_v21 = vld [vmem:[#allocation5 + $0x58] sm:$0xff]  ;;  %v51_v23 = vld [vmem:[#allocation5 + $0x48] sm:$0xff]  ;;  %v1476_v24 = vpack.c.bf16 %v622_v11, %v619_v8  ;;  %s1112_s12 = sshll.u32 %s1412_s11, 4  ;;  %s1113_s12 = int_to_ptr.vmem [resolvable:$true] %s1112_s12 }
  0x2b   :  { %v1478_v25 = vsub.f32 %v47_v7, %v622_v11  ;;  %v1480_v26 = vpack.c.bf16 %v81_v13, %v77_v12  ;;  %v1482_v27 = vsub.f32 %v42_v9, %v77_v12  ;;  %v41_v28 = vld [vmem:[#allocation2] sm:$0xff]  ;;  %v1485_v29 = vsub.f32 %v45_v10, %v81_v13  ;;  %s1377_s13 = scalar_lea.vmem %s1113_s12, 384  ;;  %p1382_p3 = scmp.lt.s32.totalorder %s1113_s12, %s1113_s12 }
  0x2c   :  { %1219 = vmatprep.subr.bf16.mxu0 %v1468_v17  ;;  %v83_v30 = vand.u32 4294901760, %v49_v14  ;;  %v625_v32 = vand.u32 4294901760, %v50_v16  ;;  %1268 = vmatpush3.bf16.msra.mxu1 %v1476_v24  ;;  %v628_v33 = vand.u32 4294901760, %v53_v21  ;;  %v85_v34 = vand.u32 4294901760, %v48_v22  ;;  %p1378_p2 = scmp.ne.s32.totalorder %s1113_s12, %s1377_s13  ;;  %p1383_p4 = scmp.lt.s32.totalorder %s1377_s13, %s1377_s13 }
  0x2d   :  { %1221 = vmatpush1.bf16.msra.mxu0 %v1480_v26  ;;  %v89_v35 = vand.u32 4294901760, %v51_v23  ;;  %v73_v36 = vsel %vm71_vm1, %v41_v28, 0  ;;  %1269 = vmatprep.subr.bf16.mxu1 %v1409_v0  ;;  %v1495_v39 = vsub.f32 %v52_v15, %v87_v31  ;;  %v161_v47 = vand.u32 4294901760, %v1470_v18 }
  0x2e   :  { %v1491_v37 = vpack.c.bf16 %v87_v31, %v83_v30  ;;  %v1493_v38 = vsub.f32 %v49_v14, %v83_v30  ;;  %v1497_v40 = vsub.f32 %v50_v16, %v625_v32  ;;  %v1499_v41 = vpack.c.bf16 %v628_v33, %v625_v32  ;;  %p1384_p5 = por %p1383_p4, %p1382_p3 }
  0x2f   :  { %v1501_v42 = vsub.f32 %v53_v21, %v628_v33  ;;  %v1503_v43 = vpack.c.bf16 %v89_v35, %v85_v34  ;;  %v1505_v44 = vsub.f32 %v48_v22, %v85_v34  ;;  %v1508_v45 = vsub.f32 %v51_v23, %v89_v35 }
  0x30   :  { %1223 = vmatprep.subr.bf16.mxu0 %v1491_v37  ;;  %v1510_v46 = vand.u32 4294901760, %v73_v36  ;;  %v173_v48 = vand.u32 4294901760, %v1472_v19  ;;  %1271 = vmatpush3.bf16.msra.mxu1 %v1499_v41  ;;  %v700_v49 = vand.u32 4294901760, %v1474_v20  ;;  %v707_v50 = vand.u32 4294901760, %v1478_v25  ;;  %p1385_p6 = pnand %p1384_p5, %p1378_p2 }
  0x31   :  { %1225 = vmatpush1.bf16.msra.mxu0 %v1503_v43  ;;  %v167_v51 = vand.u32 4294901760, %v1482_v27  ;;  %v179_v52 = vand.u32 4294901760, %v1485_v29  ;;  %1272 = vmatprep.subr.bf16.mxu1 %v1409_v0  ;;  %v162_v54 = vsub.f32 %v1470_v18, %v161_v47  ;;  %v185_v56 = vand.u32 4294901760, %v1493_v38 }
  0x32   :  { %v1521_v53 = vsub.f32 %v73_v36, %v1510_v46  ;;  %v174_v55 = vsub.f32 %v1472_v19, %v173_v48  ;;  %v701_v57 = vsub.f32 %v1474_v20, %v700_v49  ;;  %v708_v58 = vsub.f32 %v1478_v25, %v707_v50 }
  0x33   :  { %v168_v59 = vsub.f32 %v1482_v27, %v167_v51  ;;  %v180_v60 = vsub.f32 %v1485_v29, %v179_v52  ;;  %v163_v62 = vand.u32 4294901760, %v162_v54  ;;  %v186_v2 = vsub.f32 %v1493_v38, %v185_v56 }
  0x34   :  { %v1544_v61 = vand.u32 4294901760, %v1521_v53  ;;  %v175_v63 = vand.u32 4294901760, %v174_v55  ;;  %v702_v3 = vand.u32 4294901760, %v701_v57  ;;  %v709_v4 = vand.u32 4294901760, %v708_v58 }
  0x35   :  { %v169_v5 = vand.u32 4294901760, %v168_v59  ;;  %v181_v6 = vand.u32 4294901760, %v180_v60  ;;  %v187_v9 = vand.u32 4294901760, %v186_v2  ;;  %v197_v10 = vand.u32 4294901760, %v1495_v39 }
  0x36   :  { %v151_v7 = vsub.f32 %v1521_v53, %v1544_v61  ;;  %v1226_v8 = vpack.c.bf16 %v175_v63, %v163_v62  ;;  %v1273_v11 = vpack.c.bf16 %v709_v4, %v702_v3  ;;  %v714_v13 = vand.u32 4294901760, %v1497_v40 }
  0x37   :  { %v1228_v12 = vpack.c.bf16 %v181_v6, %v169_v5  ;;  %v721_v14 = vand.u32 4294901760, %v1501_v42  ;;  %v198_v16 = vsub.f32 %v1495_v39, %v197_v10  ;;  %v191_v21 = vand.u32 4294901760, %v1505_v44 }
  0x38   :  { %v152_v15 = vand.u32 4294901760, %v151_v7  ;;  %1227 = vmatprep.subr.bf16.mxu0 %v1226_v8  ;;  %v203_v22 = vand.u32 4294901760, %v1508_v45  ;;  %v715_v23 = vsub.f32 %v1497_v40, %v714_v13  ;;  %v1234_v57 = vpack.c.bf16 %v1472_v19, %v1470_v18 }
  0x39   :  { %v722_v28 = vsub.f32 %v1501_v42, %v721_v14  ;;  %v199_v30 = vand.u32 4294901760, %v198_v16  ;;  %v192_v31 = vsub.f32 %v1505_v44, %v191_v21  ;;  %v1279_v59 = vpack.c.bf16 %v1478_v25, %v1474_v20 }
  0x3a   :  { %1161 = vmatmul.mubr.f32.vlgmr.msra.gmra.mrb[0].mxu1 %v152_v15  ;;  %153 = vmatmul.mubr.f32.vlgmr.msra.gmra.mrb[0].mxu0 %v152_v15  ;;  %v204_v32 = vsub.f32 %v1508_v45, %v203_v22  ;;  %v716_v33 = vand.u32 4294901760, %v715_v23  ;;  %v1236_v60 = vpack.c.bf16 %v1485_v29, %v1482_v27  ;;  %v1238_v62 = vpack.c.bf16 %v1495_v39, %v1493_v38 }
  0x3b   :  { %1274 = vmatpush3.bf16.msra.mxu1 %v1273_v11  ;;  %1229 = vmatpush1.bf16.msra.mxu0 %v1228_v12  ;;  %v723_v34 = vand.u32 4294901760, %v722_v28  ;;  %v1230_v35 = vpack.c.bf16 %v199_v30, %v187_v9  ;;  %v193_v36 = vand.u32 4294901760, %v192_v31  ;;  %v1282_v63 = vpack.c.bf16 %v1501_v42, %v1497_v40 }
  0x3c   :  { %1275 = vmatprep.subr.bf16.mxu1 %v1409_v0  ;;  %v205_v54 = vand.u32 4294901760, %v204_v32  ;;  %1171 = vmatprep.mubr.msk.f32.mxu1 %vm1410_vm0, %v1411_v1  ;;  %v1240_v2 = vpack.c.bf16 %v1508_v45, %v1505_v44  ;;  %v1250_v3 = vpack.c.bf16 %v173_v48, %v161_v47  ;;  %v1252_v18 = vpack.c.bf16 %v179_v52, %v167_v51 }
  0x3d   :  { %v1276_v55 = vpack.c.bf16 %v723_v34, %v716_v33  ;;  %263 = vmatprep.mubr.f32.mxu0 %v1411_v1  ;;  %1231 = vmatprep.subr.bf16.mxu0 %v1230_v35  ;;  %v1254_v19 = vpack.c.bf16 %v197_v10, %v185_v56  ;;  %v1294_v20 = vpack.c.bf16 %v721_v14, %v714_v13 }
  0x3e   :  { %v1232_v58 = vpack.c.bf16 %v205_v54, %v193_v36  ;;  %v1256_v25 = vpack.c.bf16 %v203_v22, %v191_v21 }
  0x3f   :  { %1277 = vmatpush3.bf16.msra.mxu1 %v1276_v55 }
  0x40   :  { %1233 = vmatpush1.bf16.msra.mxu0 %v1232_v58  ;;  %1278 = vmatprep.subr.bf16.mxu1 %v1409_v0 }
  0x41   :  { %1235 = vmatprep.subr.bf16.mxu0 %v1234_v57 }
  0x42   :  { %1172 = vmatmul.mubr.f32.vlgmr.msra.gmra.mrb[0].mxu1 %v1510_v46 }
  0x43   :  { %265 = vmatmul.mubr.f32.vlgmr.msra.gmra.mrb[0].mxu0 %v1510_v46  ;;  %1280 = vmatpush3.bf16.msra.mxu1 %v1279_v59 }
  0x44   :  { %1237 = vmatpush1.bf16.msra.mxu0 %v1236_v60  ;;  %1281 = vmatprep.subr.bf16.mxu1 %v1409_v0 }
  0x45   :  { %1239 = vmatprep.subr.bf16.mxu0 %v1238_v62  ;;  %1182 = vmatprep.mubr.msk.f32.mxu1 %vm1410_vm0, %v1411_v1 }
  0x46   :  { %351 = vmatprep.mubr.f32.mxu0 %v1411_v1 }
  0x47   :  { %1283 = vmatpush3.bf16.msra.mxu1 %v1282_v63 }
  0x48   :  { %1241 = vmatpush1.bf16.msra.mxu0 %v1240_v2  ;;  %1284 = vmatprep.subr.bf16.mxu1 %v1409_v0 }
  0x49   :  { %1243 = vmatprep.subr.bf16.mxu0 %v1468_v17 }
  0x4a   :  { %1183 = vmatmul.mubr.f32.vlgmr.msra.gmra.mrb[0].mxu1 %v1521_v53 }
  0x4b   :  { %354 = vmatmul.mubr.f32.vlgmr.msra.gmra.mrb[0].mxu0 %v1521_v53  ;;  %1286 = vmatpush3.bf16.msra.mxu1 %v1476_v24  ;;  %v1291_v53 = vpack.c.bf16 %v707_v50, %v700_v49 }
  0x4c   :  { %1245 = vmatpush1.bf16.msra.mxu0 %v1480_v26  ;;  %1287 = vmatprep.subr.bf16.mxu1 %v1409_v0 }
  0x4d   :  { %1247 = vmatprep.subr.bf16.mxu0 %v1491_v37  ;;  %1193 = vmatprep.mubr.msk.f32.mxu1 %vm1410_vm0, %v1411_v1 }
  0x4e   :  { %432 = vmatprep.mubr.f32.mxu0 %v1411_v1 }
  0x4f   :  { %1289 = vmatpush3.bf16.msra.mxu1 %v1499_v41 }
  0x50   :  { %1249 = vmatpush1.bf16.msra.mxu0 %v1503_v43  ;;  %1290 = vmatprep.subr.bf16.mxu1 %v1409_v0 }
  0x51   :  { %1251 = vmatprep.subr.bf16.mxu0 %v1250_v3 }
  0x52   :  { %1194 = vmatmul.mubr.f32.vlgmr.msra.gmra.mrb[0].mxu1 %v1544_v61 }
  0x53   :  { %436 = vmatmul.mubr.f32.vlgmr.msra.gmra.mrb[0].mxu0 %v1544_v61  ;;  %1292 = vmatpush3.bf16.msra.mxu1 %v1291_v53 }
  0x54   :  { %1253 = vmatpush1.bf16.msra.mxu0 %v1252_v18  ;;  %1293 = vmatprep.subr.bf16.mxu1 %v1409_v0 }
  0x55   :  { %1255 = vmatprep.subr.bf16.mxu0 %v1254_v19  ;;  %1204 = vmatprep.mubr.msk.f32.mxu1 %vm1410_vm0, %v1411_v1 }
  0x56   :  { %530 = vmatprep.mubr.f32.mxu0 %v1411_v1 }
  0x57   :  { %1295 = vmatpush3.bf16.msra.mxu1 %v1294_v20 }
  0x58   :  { %1257 = vmatpush1.bf16.msra.mxu0 %v1256_v25  ;;  %1296 = vmatprep.subr.bf16.mxu1 %v1409_v0 }
  0x59   :  { %1259 = vmatprep.subr.bf16.mxu0 %v1468_v17  ;;  %v56_v17 = vlaneseq }
  0x5a   :  { %1205 = vmatmul.mubr.f32.vlgmr.msra.gmra.mrb[0].mxu1 %v1510_v46 }
  0x5b   :  { %532 = vmatmul.mubr.f32.vlgmr.msra.gmra.mrb[0].mxu0 %v1510_v46  ;;  %1298 = vmatpush3.bf16.msra.mxu1 %v1476_v24  ;;  %v57_v24 = vshrl.u32 %v56_v17, 7 }
  0x5c   :  { %1261 = vmatpush1.bf16.msra.mxu0 %v1480_v26  ;;  %1299 = vmatprep.subr.bf16.mxu1 %v1409_v0  ;;  %v54_v0 = vld [vmem:[%s1670_s2] sm:$0x7] }
  0x5d   :  { %1263 = vmatprep.subr.bf16.mxu0 %v1491_v37  ;;  %1215 = vmatprep.mubr.msk.f32.mxu1 %vm1410_vm0, %v1411_v1  ;;  %v66_v26 = vsub.s32 2, %v57_v24  ;;  %v58_v27 = vsub.s32 0, %v57_v24  ;;  %v62_v29 = vsub.s32 1, %v57_v24 }
  0x5e   :  { %610 = vmatprep.mubr.f32.mxu0 %v1411_v1 }
  0x5f   :  { %1301 = vmatpush3.bf16.msra.mxu1 %v1499_v41  ;;  %v67_v37 = vrot.slane %v54_v0, %v66_v26  ;;  %v59_v38 = vrot.slane %v54_v0, %v58_v27  ;;  %v63_v1 = vrot.slane %v54_v0, %v62_v29 }
  0x60   :  { %1265 = vmatpush1.bf16.msra.mxu0 %v1503_v43 }
  0x62   :  { %1216 = vmatmul.mubr.f32.vlgmr.msra.gmra.mrb[0].mxu1 %v1510_v46 }
  0x63   :  { %612 = vmatmul.mubr.f32.vlgmr.msra.gmra.mrb[0].mxu0 %v1510_v46 }
 0x135   :  { %v1099_v39 = vpop.f32.mrb[0].mxu1 }
 0x136   :  { %v1304_v40 = vadd.f32 %v1099_v39, %v67_v37  ;;  %v613_v41 = vpop.f32.mrb[0].mxu0  ;;  %v1217_v42 = vpop.f32.mrb[1].mxu1 }
 0x137   :  { %v1302_v43 = vadd.f32 %v613_v41, %v59_v38  ;;  %v615_v44 = vpop.f32.mrb[1].mxu0 }
 0x138   :  { %1105 = vst [vmem:[#allocation7 + $0x10] sm:$0xff] %v1304_v40  ;;  %v1303_v45 = vadd.f32 %v615_v44, %v63_v1 }
 0x139   :  { %1103 = vst [vmem:[#allocation7] sm:$0xff] %v1302_v43 }
 0x13a   :  { %1104 = vst [vmem:[#allocation7 + $0x8] sm:$0xff] %v1303_v45 }
 0x13b   :  { %1388 = shalt.err (!%p1385_p6)
}
 0x13c   :  { %s1389_s15 = scalar_lea.hbm %s1671_s3, 384 }
 0x13d   :  { %p1390_p7 = scmp.ne.s32.totalorder %s1671_s3, %s1389_s15  ;;  %p1393_p8 = scmp.lt.u32.totalorder %s1389_s15, %s1671_s3 }
 0x13f   :  { %p1395_p9 = pnand %p1393_p8, %p1390_p7 }
 0x141   :  { %1398 = shalt.err (!%p1395_p9)
}
 0x142   :  { %1115 = dma.vmem_to_hbm [thread:$0]  %s1113_s12, 384, %s1671_s3, [#allocation4]  }
 0x143   :  { %1403 = dma.done.wait [#allocation4], 384  }
 0x144   :  { %1404 = vsyncadd [#allocation4], 4294966912 }
 0x145   :  { %1119 = vsyncpa [#allocation3], 1 }
 0x146   :  { %1120 = vsyncpa [#allocation6], 1 }
 0x147   :  { %1121 = vsyncpa [#allocation4], 1 }

</bundles_post_ra>
